<compile_context>
chip_gen: v6e
topology: v6e:2x2x1
jax: 0.10.0
libtpu: 0.0.40
codegen_flags: <defaults>
</compile_context>

<pallas_src>
import jax
import jax.numpy as jnp
from jax.experimental import pallas as pl
from jax.experimental.pallas import tpu as pltpu


# --------------------------------------------------------------------------- #
# Kernel: 3 matmuls + 2 ReLUs + bias adds.  One grid step = one batch tile.
# --------------------------------------------------------------------------- #
def qnetwork_kernel(x_ref, w1_ref, b1_ref, w2_ref, b2_ref, w3_ref, b3_ref,
                    q_ref):
    # fc1 + ReLU                                       (TB, S) @ (S, F1pad)
    h1 = jnp.dot(x_ref[...], w1_ref[...],
                 preferred_element_type=jnp.float32) + b1_ref[...]
    h1 = jnp.maximum(h1, 0.0)

    # fused fc2_val|fc2_adv + ReLU                     (TB, F1pad) @ (F1pad, 2*F2)
    h2 = jnp.dot(h1.astype(w2_ref.dtype), w2_ref[...],
                 preferred_element_type=jnp.float32) + b2_ref[...]
    h2 = jnp.maximum(h2, 0.0)

    # fused fc3 + dueling combine (pre-folded)         (TB, 2*F2) @ (2*F2, Apad)
    q_ref[...] = (jnp.dot(h2.astype(w3_ref.dtype), w3_ref[...],
                          preferred_element_type=jnp.float32)
                  + b3_ref[...]).astype(q_ref.dtype)


# --------------------------------------------------------------------------- #
# Parameter fusion (done once, outside the kernel).
#   Q_j = V + A_j - mean_k A_k
#       = hv @ w3v + b3v + ha @ (w3a[:,j] - mean_col) + (b3a[j] - mean_b)
# so with h2 = [hv | ha] the whole head is a single matmul.
# --------------------------------------------------------------------------- #
def _round_up(x, m):
    return ((x + m - 1) // m) * m


def fuse_params(p, action_size, out_pad=128, fc1_pad=128,
                param_dtype=jnp.bfloat16):
    A = action_size
    S, F1 = p["w1"].shape
    a_pad = _round_up(max(A, out_pad), out_pad)
    f1_pad = _round_up(max(F1, fc1_pad), fc1_pad)

    # fc1 padded to a lane-dense hidden width (padded units are exact zeros:
    # zero weights + zero bias -> relu(0) = 0, so downstream is unaffected).
    w1 = jnp.pad(p["w1"], ((0, 0), (0, f1_pad - F1)))
    b1 = jnp.pad(p["b1"], ((0, 0), (0, f1_pad - F1)))

    # fc2 streams side by side -> lane-dense (F1pad, 2*F2); padded h1 units get
    # zero weight rows.
    w2 = jnp.concatenate([p["w2v"], p["w2a"]], axis=1)
    w2 = jnp.pad(w2, ((0, f1_pad - F1), (0, 0)))
    b2 = jnp.concatenate([p["b2v"], p["b2a"]], axis=1)

    # dueling combine folded into the last layer
    w3a_c = p["w3a"] - jnp.mean(p["w3a"], axis=1, keepdims=True)   # (F2, A)
    b3a_c = p["b3a"] - jnp.mean(p["b3a"], axis=1, keepdims=True)   # (1, A)
    w3v_b = jnp.tile(p["w3v"], (1, A))                             # (F2, A)
    w3 = jnp.concatenate([w3v_b, w3a_c], axis=0)                   # (2*F2, A)
    b3 = p["b3v"] + b3a_c                                          # (1, A)

    # pad the output head to a lane-dense width; padded cols are exact zeros
    w3 = jnp.pad(w3, ((0, 0), (0, a_pad - A)))
    b3 = jnp.pad(b3, ((0, 0), (0, a_pad - A)))

    # MXU operands in param_dtype (bf16 halves weight DMA/VMEM and doubles MXU
    # issue rate on v6e/v7x); biases stay f32 so the bias-add/ReLU tail runs on
    # the f32 VPU path on every chip generation (v5e has no bf16 VPU).
    return dict(w1=w1.astype(param_dtype), b1=b1.astype(jnp.float32),
                w2=w2.astype(param_dtype), b2=b2.astype(jnp.float32),
                w3=w3.astype(param_dtype), b3=b3.astype(jnp.float32))


# --------------------------------------------------------------------------- #
# Wrapper: 1-D grid over batch (collapses to a single step for B <= block_b),
# weights resident in VMEM across the grid.
# --------------------------------------------------------------------------- #
def _pick_batch_tile(B, block_b):
    if B <= block_b:
        return B                       # single grid step: no per-step overhead
    n_tiles = pl.cdiv(B, block_b)
    n_tiles += n_tiles % 2             # even tile count -> balanced 2-TC split (v7x)
    tb = _round_up(pl.cdiv(B, n_tiles), 8)   # sublane-aligned batch tile
    return min(tb, B)


def qnetwork_forward(state, fused, action_size, block_b=2048):
    B, S = state.shape
    a_pad = fused["w3"].shape[1]
    tb = _pick_batch_tile(B, block_b)
    grid = (pl.cdiv(B, tb),)

    def resident(arr):  # full-array block, constant index -> stays in VMEM
        return pl.BlockSpec(arr.shape, lambda i: (0, 0))

    # cast the MXU LHS once in the wrapper (halves the state-tile DMA too)
    x = state.astype(fused["w1"].dtype)

    q_pad = pl.pallas_call(
        qnetwork_kernel,
        out_shape=jax.ShapeDtypeStruct((B, a_pad), jnp.float32),
        grid=grid,
        in_specs=[
            pl.BlockSpec((tb, S), lambda i: (i, 0)),      # state tile
            resident(fused["w1"]), resident(fused["b1"]),
            resident(fused["w2"]), resident(fused["b2"]),
            resident(fused["w3"]), resident(fused["b3"]),
        ],
        out_specs=pl.BlockSpec((tb, a_pad), lambda i: (i, 0)),
        compiler_params=pltpu.CompilerParams(
            dimension_semantics=("parallel",)),
    )(x, fused["w1"], fused["b1"], fused["w2"], fused["b2"],
      fused["w3"], fused["b3"])

    return q_pad[:, :action_size]


# --------------------------------------------------------------------------- #
# Init (mimics PyTorch nn.Linear default U(-1/sqrt(fan_in), +1/sqrt(fan_in)));
# weights stored as (in, out), biases as (1, out).
# --------------------------------------------------------------------------- #
def init_params(key, state_size, action_size, fc1_units=64, fc2_units=64):
    def linear(key, fan_in, fan_out):
        kw, kb = jax.random.split(key)
        bound = 1.0 / jnp.sqrt(fan_in)
        w = jax.random.uniform(kw, (fan_in, fan_out), jnp.float32, -bound, bound)
        b = jax.random.uniform(kb, (1, fan_out), jnp.float32, -bound, bound)
        return w, b

    k1, k2, k3, k4, k5 = jax.random.split(key, 5)
    w1, b1 = linear(k1, state_size, fc1_units)
    w2v, b2v = linear(k2, fc1_units, fc2_units)
    w2a, b2a = linear(k3, fc1_units, fc2_units)
    w3v, b3v = linear(k4, fc2_units, 1)
    w3a, b3a = linear(k5, fc2_units, action_size)
    return dict(w1=w1, b1=b1, w2v=w2v, b2v=b2v, w2a=w2a, b2a=b2a,
                w3v=w3v, b3v=b3v, w3a=w3a, b3a=b3a)


def qnetwork_reference(state, p):
    """Pure-JAX f32 mirror of the PyTorch forward (unfused)."""
    h1 = jax.nn.relu(state @ p["w1"] + p["b1"])
    hv = jax.nn.relu(h1 @ p["w2v"] + p["b2v"])
    ha = jax.nn.relu(h1 @ p["w2a"] + p["b2a"])
    val = hv @ p["w3v"] + p["b3v"]                     # (B, 1) -> broadcast
    adv = ha @ p["w3a"] + p["b3a"]                     # (B, A)
    return val + adv - jnp.mean(adv, axis=1, keepdims=True)


def qnetwork_fused_reference(state, fused, action_size):
    """Pure-JAX mirror of the kernel's fused math (same operand dtypes and
    f32 accumulation) — isolates Pallas correctness from bf16 rounding."""
    x = state.astype(fused["w1"].dtype)
    h1 = jax.nn.relu(jnp.dot(x, fused["w1"],
                             preferred_element_type=jnp.float32) + fused["b1"])
    h2 = jax.nn.relu(jnp.dot(h1.astype(fused["w2"].dtype), fused["w2"],
                             preferred_element_type=jnp.float32) + fused["b2"])
    q = jnp.dot(h2.astype(fused["w3"].dtype), fused["w3"],
                preferred_element_type=jnp.float32) + fused["b3"]
    return q[:, :action_size]


if __name__ == "__main__":
    state_size = 8
    action_size = 4
    batch = 256          # one grid step (tb = B = 256 <= block_b)

    key = jax.random.PRNGKey(0)
    k_params, k_state = jax.random.split(key)
    params = init_params(k_params, state_size, action_size)
    state = jax.random.normal(k_state, (batch, state_size), jnp.float32)

    q_ref = qnetwork_reference(state, params)

    # 1) f32 parameter path: kernel + dueling fold must match the unfused
    #    PyTorch-style forward to tight tolerance.
    fused_f32 = fuse_params(params, action_size, param_dtype=jnp.float32)
    q_f32 = jax.block_until_ready(qnetwork_forward(state, fused_f32, action_size))
    assert q_f32.shape == (batch, action_size)
    assert jnp.allclose(q_f32, q_ref, atol=1e-4, rtol=1e-4)

    # 2) bf16-operand path (perf default): must match the numerics-matched
    #    fused reference (bf16 operands, f32 accumulation) to tight tolerance.
    fused_bf16 = fuse_params(params, action_size, param_dtype=jnp.bfloat16)
    q_bf16 = jax.block_until_ready(qnetwork_forward(state, fused_bf16, action_size))
    q_ref_bf16 = qnetwork_fused_reference(state, fused_bf16, action_size)
    assert q_bf16.shape == (batch, action_size)
    assert jnp.allclose(q_bf16, q_ref_bf16, atol=2e-3, rtol=2e-3)

    print("KERNEL_OK")
</pallas_src>

<mosaic_0001>
module attributes {stable_mosaic.version = 11 : i64} {
  func.func @qnetwork_kernel(%arg0: i32, %arg1: memref<256x8xf32, #tpu.memory_space<vmem>>, %arg2: memref<8x128xf32, #tpu.memory_space<vmem>>, %arg3: memref<1x128xf32, #tpu.memory_space<vmem>>, %arg4: memref<128x128xf32, #tpu.memory_space<vmem>>, %arg5: memref<1x128xf32, #tpu.memory_space<vmem>>, %arg6: memref<128x128xf32, #tpu.memory_space<vmem>>, %arg7: memref<1x128xf32, #tpu.memory_space<vmem>>, %arg8: memref<256x128xf32, #tpu.memory_space<vmem>>) attributes {dimension_semantics = [#tpu.dimension_semantics<parallel>], iteration_bounds = array<i64: 1>, scalar_prefetch = 0 : i64, scratch_operands = 0 : i64, tpu.core_type = #tpu.core_type<tc>, window_params = [{transform_indices = @transform_0, window_bounds = array<i64: 256, 8>}, {pipeline_mode = #tpu.pipeline_mode<synchronous>, transform_indices = @transform_1, window_bounds = array<i64: 8, 128>}, {pipeline_mode = #tpu.pipeline_mode<synchronous>, transform_indices = @transform_2, window_bounds = array<i64: 1, 128>}, {pipeline_mode = #tpu.pipeline_mode<synchronous>, transform_indices = @transform_3, window_bounds = array<i64: 128, 128>}, {pipeline_mode = #tpu.pipeline_mode<synchronous>, transform_indices = @transform_4, window_bounds = array<i64: 1, 128>}, {pipeline_mode = #tpu.pipeline_mode<synchronous>, transform_indices = @transform_5, window_bounds = array<i64: 128, 128>}, {pipeline_mode = #tpu.pipeline_mode<synchronous>, transform_indices = @transform_6, window_bounds = array<i64: 1, 128>}, {transform_indices = @transform_7, window_bounds = array<i64: 256, 128>}]} {
    %c0 = arith.constant 0 : index
    %c0_0 = arith.constant 0 : index
    %0 = vector.load %arg1[%c0, %c0_0] : memref<256x8xf32, #tpu.memory_space<vmem>>, vector<256x8xf32>
    %c0_1 = arith.constant 0 : index
    %c0_2 = arith.constant 0 : index
    %1 = vector.load %arg2[%c0_1, %c0_2] : memref<8x128xf32, #tpu.memory_space<vmem>>, vector<8x128xf32>
    %cst = arith.constant dense<0.000000e+00> : vector<256x128xf32>
    %2 = tpu.matmul %0, %1, %cst {dimension_numbers = #tpu.dot_dimension_numbers<[1], [0], [0], [1], [0, 0, 1, 1], [], []>} : vector<256x8xf32>, vector<8x128xf32>, vector<256x128xf32> -> vector<256x128xf32>
    %c0_3 = arith.constant 0 : index
    %c0_4 = arith.constant 0 : index
    %3 = vector.load %arg3[%c0_3, %c0_4] : memref<1x128xf32, #tpu.memory_space<vmem>>, vector<1x128xf32>
    %4 = vector.broadcast %3 : vector<1x128xf32> to vector<256x128xf32>
    %5 = arith.addf %2, %4 : vector<256x128xf32>
    %cst_5 = arith.constant 0.000000e+00 : f32
    %6 = vector.broadcast %cst_5 : f32 to vector<256x128xf32>
    %7 = arith.maximumf %5, %6 : vector<256x128xf32>
    %c0_6 = arith.constant 0 : index
    %c0_7 = arith.constant 0 : index
    %8 = vector.load %arg4[%c0_6, %c0_7] : memref<128x128xf32, #tpu.memory_space<vmem>>, vector<128x128xf32>
    %cst_8 = arith.constant dense<0.000000e+00> : vector<256x128xf32>
    %9 = tpu.matmul %7, %8, %cst_8 {dimension_numbers = #tpu.dot_dimension_numbers<[1], [0], [0], [1], [0, 0, 1, 1], [], []>} : vector<256x128xf32>, vector<128x128xf32>, vector<256x128xf32> -> vector<256x128xf32>
    %c0_9 = arith.constant 0 : index
    %c0_10 = arith.constant 0 : index
    %10 = vector.load %arg5[%c0_9, %c0_10] : memref<1x128xf32, #tpu.memory_space<vmem>>, vector<1x128xf32>
    %11 = vector.broadcast %10 : vector<1x128xf32> to vector<256x128xf32>
    %12 = arith.addf %9, %11 : vector<256x128xf32>
    %cst_11 = arith.constant 0.000000e+00 : f32
    %13 = vector.broadcast %cst_11 : f32 to vector<256x128xf32>
    %14 = arith.maximumf %12, %13 : vector<256x128xf32>
    %c0_12 = arith.constant 0 : index
    %c0_13 = arith.constant 0 : index
    %15 = vector.load %arg6[%c0_12, %c0_13] : memref<128x128xf32, #tpu.memory_space<vmem>>, vector<128x128xf32>
    %cst_14 = arith.constant dense<0.000000e+00> : vector<256x128xf32>
    %16 = tpu.matmul %14, %15, %cst_14 {dimension_numbers = #tpu.dot_dimension_numbers<[1], [0], [0], [1], [0, 0, 1, 1], [], []>} : vector<256x128xf32>, vector<128x128xf32>, vector<256x128xf32> -> vector<256x128xf32>
    %c0_15 = arith.constant 0 : index
    %c0_16 = arith.constant 0 : index
    %17 = vector.load %arg7[%c0_15, %c0_16] : memref<1x128xf32, #tpu.memory_space<vmem>>, vector<1x128xf32>
    %18 = vector.broadcast %17 : vector<1x128xf32> to vector<256x128xf32>
    %19 = arith.addf %16, %18 : vector<256x128xf32>
    %c0_17 = arith.constant 0 : index
    %c0_18 = arith.constant 0 : index
    %20 = vector.load %arg8[%c0_17, %c0_18] : memref<256x128xf32, #tpu.memory_space<vmem>>, vector<256x128xf32>
    tpu.vector_store %arg8[%c0_17, %c0_18], %19 {strides = array<i32>} : memref<256x128xf32, #tpu.memory_space<vmem>>, vector<256x128xf32>,
    return
  }
  func.func @transform_0(%arg0: i32) -> (i32, i32) {
    %c0_i32 = arith.constant 0 : i32
    %c0_i32_0 = arith.constant 0 : i32
    return %arg0, %c0_i32 : i32, i32
  }
  func.func @transform_1(%arg0: i32) -> (i32, i32) {
    %c0_i32 = arith.constant 0 : i32
    %c0_i32_0 = arith.constant 0 : i32
    %c0_i32_1 = arith.constant 0 : i32
    return %c0_i32, %c0_i32_0 : i32, i32
  }
  func.func @transform_2(%arg0: i32) -> (i32, i32) {
    %c0_i32 = arith.constant 0 : i32
    %c0_i32_0 = arith.constant 0 : i32
    %c0_i32_1 = arith.constant 0 : i32
    return %c0_i32, %c0_i32_0 : i32, i32
  }
  func.func @transform_3(%arg0: i32) -> (i32, i32) {
    %c0_i32 = arith.constant 0 : i32
    %c0_i32_0 = arith.constant 0 : i32
    %c0_i32_1 = arith.constant 0 : i32
    return %c0_i32, %c0_i32_0 : i32, i32
  }
  func.func @transform_4(%arg0: i32) -> (i32, i32) {
    %c0_i32 = arith.constant 0 : i32
    %c0_i32_0 = arith.constant 0 : i32
    %c0_i32_1 = arith.constant 0 : i32
    return %c0_i32, %c0_i32_0 : i32, i32
  }
  func.func @transform_5(%arg0: i32) -> (i32, i32) {
    %c0_i32 = arith.constant 0 : i32
    %c0_i32_0 = arith.constant 0 : i32
    %c0_i32_1 = arith.constant 0 : i32
    return %c0_i32, %c0_i32_0 : i32, i32
  }
  func.func @transform_6(%arg0: i32) -> (i32, i32) {
    %c0_i32 = arith.constant 0 : i32
    %c0_i32_0 = arith.constant 0 : i32
    %c0_i32_1 = arith.constant 0 : i32
    return %c0_i32, %c0_i32_0 : i32, i32
  }
  func.func @transform_7(%arg0: i32) -> (i32, i32) {
    %c0_i32 = arith.constant 0 : i32
    %c0_i32_0 = arith.constant 0 : i32
    return %arg0, %c0_i32 : i32, i32
  }
}

</mosaic_0001>

<bundles_post_ra>
// kernel: tpu_custom_call.1
= control target key start
LH: loop header
LB: loop body
LE: loop exit
PB: predicated region body
PF: predicated region fallthrough
CT: control target
= control target key end

     0   :  { %vm67_vm0 = vcmask 64512   ;;  %s1791_s0 = inlined_call_operand.vmem [shape: f32[256,8], index: 0, kind: input, shape index: {}]   ;;  %s1792_s1 = inlined_call_operand.vmem [shape: f32[8,128], index: 1, kind: input, shape index: {}]   ;;  %s1793_s2 = inlined_call_operand.vmem [shape: f32[1,128], index: 2, kind: input, shape index: {}]   ;;  %s1794_s3 = inlined_call_operand.vmem [shape: f32[128,128], index: 3, kind: input, shape index: {}]   ;;  %s1795_s4 = inlined_call_operand.vmem [shape: f32[1,128], index: 4, kind: input, shape index: {}]   ;;  %s1796_s5 = inlined_call_operand.vmem [shape: f32[128,128], index: 5, kind: input, shape index: {}]   ;;  %s1797_s6 = inlined_call_operand.vmem [shape: f32[1,128], index: 6, kind: input, shape index: {}]   ;;  %s1798_s7 = inlined_call_operand.hbm [shape: f32[256,128], index: 7, kind: output, shape index: {}]  }
   0x1   :  { %v59_v0 = vld [vmem:[%s1792_s1] sm:$0xff]  ;;  %v28_v2 = vld [vmem:[%s1791_s0 + $0x8] sm:$0xff]  ;;  %v29_v3 = vld [vmem:[%s1791_s0 + $0x10] sm:$0xff] }
   0x2   :  { %v27_v1 = vld [vmem:[%s1791_s0] sm:$0xff]  ;;  %1161 = vmatprep.subr.mxu0 %v59_v0  ;;  %1371 = vmatprep.subr.mxu1 %v59_v0  ;;  %v30_v4 = vld [vmem:[%s1791_s0 + $0x18] sm:$0xff]  ;;  %v44_v7 = vld [vmem:[%s1791_s0 + $0x88] sm:$0xff] }
   0x3   :  { %1163 = vmatprep.mubr.msk.f32.mxu0 %vm67_vm0, %v27_v1  ;;  %1162 = vmatpush3.msra.mxu0 %v59_v0  ;;  %v31_v5 = vld [vmem:[%s1791_s0 + $0x20] sm:$0xff]  ;;  %v45_v8 = vld [vmem:[%s1791_s0 + $0x90] sm:$0xff]  ;;  %v32_v9 = vld [vmem:[%s1791_s0 + $0x28] sm:$0xff] }
   0x4   :  { %1164 = vmatmul.mubr.msk.f32.vlgmr.msra.gmra.mxu0 %vm67_vm0, %v28_v2  ;;  %1372 = vmatpush3.msra.mxu1 %v59_v0  ;;  %v43_v6 = vld [vmem:[%s1791_s0 + $0x80] sm:$0xff]  ;;  %v46_v10 = vld [vmem:[%s1791_s0 + $0x98] sm:$0xff]  ;;  %v33_v11 = vld [vmem:[%s1791_s0 + $0x30] sm:$0xff] }
   0x5   :  { %1166 = vmatprep.mubr.msk.f32.mxu0 %vm67_vm0, %v29_v3  ;;  %1187 = vmatprep.mubr.msk.f32.mxu1 %vm67_vm0, %v43_v6  ;;  %v47_v12 = vld [vmem:[%s1791_s0 + $0xa0] sm:$0xff]  ;;  %v436_v13 = vld [vmem:[%s1794_s3 + $0x78] sm:$0xff]  ;;  %v48_v15 = vld [vmem:[%s1791_s0 + $0xa8] sm:$0xff] }
   0x6   :  { %1188 = vmatmul.mubr.msk.f32.vlgmr.msra.gmra.mxu1 %vm67_vm0, %v44_v7  ;;  %v34_v14 = vld [vmem:[%s1791_s0 + $0x38] sm:$0xff]  ;;  %v35_v16 = vld [vmem:[%s1791_s0 + $0x40] sm:$0xff]  ;;  %v49_v17 = vld [vmem:[%s1791_s0 + $0xb0] sm:$0xff]  ;;  %1211 = vmatprep.subr.mxu1 %v436_v13 }
   0x7   :  { %1190 = vmatprep.mubr.msk.f32.mxu1 %vm67_vm0, %v45_v8  ;;  %1212 = vmatpush3.msra.mxu1 %v436_v13  ;;  %v435_v18 = vld [vmem:[%s1794_s3 + $0x70] sm:$0xff] }
   0x8   :  { %1167 = vmatmul.mubr.msk.f32.gmra.mxu0 %vm67_vm0, %v30_v4 }
   0x9   :  { %1169 = vmatprep.mubr.msk.f32.mxu0 %vm67_vm0, %v31_v5 }
   0xa   :  { %1191 = vmatmul.mubr.msk.f32.gmra.mxu1 %vm67_vm0, %v46_v10 }
   0xb   :  { %1193 = vmatprep.mubr.msk.f32.mxu1 %vm67_vm0, %v47_v12 }
   0xc   :  { %1170 = vmatmul.mubr.msk.f32.gmra.mxu0 %vm67_vm0, %v32_v9 }
   0xd   :  { %1172 = vmatprep.mubr.msk.f32.mxu0 %vm67_vm0, %v33_v11 }
   0xe   :  { %1194 = vmatmul.mubr.msk.f32.gmra.mxu1 %vm67_vm0, %v48_v15 }
  0x10   :  { %1173 = vmatmul.mubr.msk.f32.gmra.mxu0 %vm67_vm0, %v34_v14 }
  0x11   :  { %12 = vsyncpa [#allocation3], 0  ;;  %1175 = vmatprep.mubr.msk.f32.mxu0 %vm67_vm0, %v35_v16  ;;  %v36_v19 = vld [vmem:[%s1791_s0 + $0x48] sm:$0xff]  ;;  %1196 = vmatprep.mubr.msk.f32.mxu1 %vm67_vm0, %v49_v17  ;;  %v50_v20 = vld [vmem:[%s1791_s0 + $0xb8] sm:$0xff] }
  0x12   :  { %v37_v21 = vld [vmem:[%s1791_s0 + $0x50] sm:$0xff]  ;;  %v51_v22 = vld [vmem:[%s1791_s0 + $0xc0] sm:$0xff]  ;;  %1213 = vmatprep.subr.mxu1 %v435_v18  ;;  %v434_v23 = vld [vmem:[%s1794_s3 + $0x68] sm:$0xff]  ;;  %1197 = vmatmul.mubr.msk.f32.gmra.mxu1 %vm67_vm0, %v50_v20 }
  0x13   :  { %1214 = vmatpush3.msra.mxu1 %v435_v18  ;;  %v38_v24 = vld [vmem:[%s1791_s0 + $0x58] sm:$0xff]  ;;  %1199 = vmatprep.mubr.msk.f32.mxu1 %vm67_vm0, %v51_v22  ;;  %v52_v25 = vld [vmem:[%s1791_s0 + $0xc8] sm:$0xff]  ;;  %v39_v26 = vld [vmem:[%s1791_s0 + $0x60] sm:$0xff] }
  0x14   :  { %1176 = vmatmul.mubr.msk.f32.gmra.mxu0 %vm67_vm0, %v36_v19  ;;  %v53_v27 = vld [vmem:[%s1791_s0 + $0xd0] sm:$0xff]  ;;  %1215 = vmatprep.subr.mxu1 %v434_v23  ;;  %v433_v28 = vld [vmem:[%s1794_s3 + $0x60] sm:$0xff]  ;;  %v40_v29 = vld [vmem:[%s1791_s0 + $0x68] sm:$0xff] }
  0x15   :  { %1178 = vmatprep.mubr.msk.f32.mxu0 %vm67_vm0, %v37_v21  ;;  %1216 = vmatpush3.msra.mxu1 %v434_v23  ;;  %v54_v30 = vld [vmem:[%s1791_s0 + $0xd8] sm:$0xff]  ;;  %v41_v31 = vld [vmem:[%s1791_s0 + $0x70] sm:$0xff]  ;;  %v55_v32 = vld [vmem:[%s1791_s0 + $0xe0] sm:$0xff] }
  0x16   :  { %1200 = vmatmul.mubr.msk.f32.gmra.mxu1 %vm67_vm0, %v52_v25  ;;  %1217 = vmatprep.subr.mxu1 %v433_v28  ;;  %v432_v33 = vld [vmem:[%s1794_s3 + $0x58] sm:$0xff]  ;;  %v56_v35 = vld [vmem:[%s1791_s0 + $0xe8] sm:$0xff]  ;;  %v57_v36 = vld [vmem:[%s1791_s0 + $0xf0] sm:$0xff] }
  0x17   :  { %1202 = vmatprep.mubr.msk.f32.mxu1 %vm67_vm0, %v53_v27  ;;  %1218 = vmatpush3.msra.mxu1 %v433_v28  ;;  %v42_v34 = vld [vmem:[%s1791_s0 + $0x78] sm:$0xff]  ;;  %v431_v37 = vld [vmem:[%s1794_s3 + $0x50] sm:$0xff]  ;;  %v430_v38 = vld [vmem:[%s1794_s3 + $0x48] sm:$0xff] }
  0x18   :  { %1179 = vmatmul.mubr.msk.f32.gmra.mxu0 %vm67_vm0, %v38_v24  ;;  %1219 = vmatprep.subr.mxu1 %v432_v33  ;;  %v58_v39 = vld [vmem:[%s1791_s0 + $0xf8] sm:$0xff]  ;;  %v429_v40 = vld [vmem:[%s1794_s3 + $0x40] sm:$0xff]  ;;  %v427_v42 = vld [vmem:[%s1794_s3 + $0x30] sm:$0xff] }
  0x19   :  { %1181 = vmatprep.mubr.msk.f32.mxu0 %vm67_vm0, %v39_v26  ;;  %1220 = vmatpush3.msra.mxu1 %v432_v33  ;;  %v428_v41 = vld [vmem:[%s1794_s3 + $0x38] sm:$0xff]  ;;  %v426_v43 = vld [vmem:[%s1794_s3 + $0x28] sm:$0xff]  ;;  %v425_v44 = vld [vmem:[%s1794_s3 + $0x20] sm:$0xff] }
  0x1a   :  { %1203 = vmatmul.mubr.msk.f32.gmra.mxu1 %vm67_vm0, %v54_v30  ;;  %1221 = vmatprep.subr.mxu1 %v431_v37  ;;  %v424_v45 = vld [vmem:[%s1794_s3 + $0x18] sm:$0xff]  ;;  %v423_v46 = vld [vmem:[%s1794_s3 + $0x10] sm:$0xff]  ;;  %v422_v47 = vld [vmem:[%s1794_s3 + $0x8] sm:$0xff] }
  0x1b   :  { %1205 = vmatprep.mubr.msk.f32.mxu1 %vm67_vm0, %v55_v32  ;;  %1222 = vmatpush3.msra.mxu1 %v431_v37  ;;  %v421_v48 = vld [vmem:[%s1794_s3] sm:$0xff]  ;;  %v716_v49 = vld [vmem:[%s1796_s5 + $0x78] sm:$0xff]  ;;  %v715_v50 = vld [vmem:[%s1796_s5 + $0x70] sm:$0xff] }
  0x1c   :  { %1182 = vmatmul.mubr.msk.f32.gmra.mxu0 %vm67_vm0, %v40_v29  ;;  %1223 = vmatprep.subr.mxu1 %v430_v38  ;;  %v714_v51 = vld [vmem:[%s1796_s5 + $0x68] sm:$0xff]  ;;  %v713_v52 = vld [vmem:[%s1796_s5 + $0x60] sm:$0xff]  ;;  %v712_v53 = vld [vmem:[%s1796_s5 + $0x58] sm:$0xff] }
  0x1d   :  { %1184 = vmatprep.mubr.msk.f32.mxu0 %vm67_vm0, %v41_v31  ;;  %1224 = vmatpush3.msra.mxu1 %v430_v38  ;;  %v711_v54 = vld [vmem:[%s1796_s5 + $0x50] sm:$0xff]  ;;  %v710_v55 = vld [vmem:[%s1796_s5 + $0x48] sm:$0xff]  ;;  %v709_v56 = vld [vmem:[%s1796_s5 + $0x40] sm:$0xff] }
  0x1e   :  { %1206 = vmatmul.mubr.msk.f32.gmra.mxu1 %vm67_vm0, %v56_v35  ;;  %1225 = vmatprep.subr.mxu1 %v429_v40  ;;  %v708_v57 = vld [vmem:[%s1796_s5 + $0x38] sm:$0xff]  ;;  %v707_v58 = vld [vmem:[%s1796_s5 + $0x30] sm:$0xff]  ;;  %v706_v59 = vld [vmem:[%s1796_s5 + $0x28] sm:$0xff] }
  0x1f   :  { %1208 = vmatprep.mubr.msk.f32.mxu1 %vm67_vm0, %v57_v36  ;;  %1226 = vmatpush3.msra.mxu1 %v429_v40  ;;  %v705_v60 = vld [vmem:[%s1796_s5 + $0x20] sm:$0xff]  ;;  %v704_v61 = vld [vmem:[%s1796_s5 + $0x18] sm:$0xff] }
  0x20   :  { %1185 = vmatmul.mubr.msk.f32.gmra.mxu0 %vm67_vm0, %v42_v34  ;;  %1227 = vmatprep.subr.mxu1 %v428_v41  ;;  %v1662_v62 = vld [vmem:[%s1793_s2] ss:$0 sm:$0xff] }
  0x21   :  { %1228 = vmatpush3.msra.mxu1 %v428_v41  ;;  %1291 = vmatprep.subr.mxu0 %v716_v49 }
  0x22   :  { %1209 = vmatmul.mubr.msk.f32.gmra.mxu1 %vm67_vm0, %v58_v39  ;;  %1229 = vmatprep.subr.mxu1 %v427_v42 }
  0x23   :  { %1230 = vmatpush3.msra.mxu1 %v427_v42  ;;  %1292 = vmatpush3.msra.mxu0 %v716_v49 }
  0x24   :  { %1231 = vmatprep.subr.mxu1 %v426_v43  ;;  %1293 = vmatprep.subr.mxu0 %v715_v50 }
  0x25   :  { %1232 = vmatpush3.msra.mxu1 %v426_v43  ;;  %1294 = vmatpush3.msra.mxu0 %v715_v50 }
  0x26   :  { %1233 = vmatprep.subr.mxu1 %v425_v44  ;;  %1295 = vmatprep.subr.mxu0 %v714_v51 }
  0x27   :  { %1234 = vmatpush3.msra.mxu1 %v425_v44  ;;  %1296 = vmatpush3.msra.mxu0 %v714_v51 }
  0x28   :  { %1235 = vmatprep.subr.mxu1 %v424_v45  ;;  %1297 = vmatprep.subr.mxu0 %v713_v52 }
  0x29   :  { %1236 = vmatpush3.msra.mxu1 %v424_v45  ;;  %1298 = vmatpush3.msra.mxu0 %v713_v52 }
  0x2a   :  { %1237 = vmatprep.subr.mxu1 %v423_v46  ;;  %1299 = vmatprep.subr.mxu0 %v712_v53 }
  0x2b   :  { %1238 = vmatpush3.msra.mxu1 %v423_v46  ;;  %1300 = vmatpush3.msra.mxu0 %v712_v53 }
  0x2c   :  { %1239 = vmatprep.subr.mxu1 %v422_v47  ;;  %1301 = vmatprep.subr.mxu0 %v711_v54 }
  0x2d   :  { %1240 = vmatpush3.msra.mxu1 %v422_v47  ;;  %1302 = vmatpush3.msra.mxu0 %v711_v54 }
  0x2e   :  { %1241 = vmatprep.subr.mxu1 %v421_v48  ;;  %1303 = vmatprep.subr.mxu0 %v710_v55 }
  0x2f   :  { %1242 = vmatpush3.msra.mxu1 %v421_v48  ;;  %1304 = vmatpush3.msra.mxu0 %v710_v55 }
  0x30   :  { %1305 = vmatprep.subr.mxu0 %v709_v56 }
  0x31   :  { %1306 = vmatpush3.msra.mxu0 %v709_v56 }
  0x32   :  { %1307 = vmatprep.subr.mxu0 %v708_v57 }
  0x33   :  { %1308 = vmatpush3.msra.mxu0 %v708_v57 }
  0x34   :  { %1309 = vmatprep.subr.mxu0 %v707_v58 }
  0x35   :  { %1310 = vmatpush3.msra.mxu0 %v707_v58 }
  0x36   :  { %1311 = vmatprep.subr.mxu0 %v706_v59 }
  0x37   :  { %1312 = vmatpush3.msra.mxu0 %v706_v59 }
  0x38   :  { %1313 = vmatprep.subr.mxu0 %v705_v60 }
  0x39   :  { %1314 = vmatpush3.msra.mxu0 %v705_v60 }
  0x3a   :  { %1315 = vmatprep.subr.mxu0 %v704_v61 }
  0x3b   :  { %1316 = vmatpush3.msra.mxu0 %v704_v61 }
  0xc4   :  { %v1165_v63 = vpop.f32.mrf.mxu0 }
  0xc5   :  { %v236_v0 = vadd.f32 %v1165_v63, %v1662_v62 }
  0xc6   :  { %v230_v1 = vpop.f32.mrf.mxu0  ;;  %v1666_v4 = vpop.f32.mrf.mxu1 }
  0xc7   :  { %v231_v2 = vadd.f32 %v1662_v62, %v230_v1  ;;  %v390_v6 = vmax.f32 %v236_v0, 0.0  ;;  %v316_v60 = vadd.f32 %v1666_v4, %v1662_v62 }
  0xc8   :  { %v1168_v3 = vpop.f32.mrf.mxu0  ;;  %v310_v9 = vpop.f32.mrf.mxu1 }
  0xc9   :  { %v389_v5 = vmax.f32 %v231_v2, 0.0  ;;  %v246_v7 = vadd.f32 %v1168_v3, %v1662_v62  ;;  %v311_v50 = vadd.f32 %v1662_v62, %v310_v9  ;;  %v406_v1 = vmax.f32 %v316_v60, 0.0 }
  0xca   :  { %v240_v8 = vpop.f32.mrf.mxu0  ;;  %v1670_v12 = vpop.f32.mrf.mxu1 }
  0xcb   :  { %v241_v10 = vadd.f32 %v1662_v62, %v240_v8  ;;  %1243 = vmatprep.mubr.f32.mxu1 %v389_v5  ;;  %v392_v14 = vmax.f32 %v246_v7, 0.0  ;;  %v405_v57 = vmax.f32 %v311_v50, 0.0  ;;  %v326_v2 = vadd.f32 %v1670_v12, %v1662_v62 }
  0xcc   :  { %v1171_v11 = vpop.f32.mrf.mxu0  ;;  %1244 = vmatmul.mubr.f32.vlgmr.msra.gmra.mxu1 %v390_v6  ;;  %v320_v17 = vpop.f32.mrf.mxu1 }
  0xcd   :  { %v391_v13 = vmax.f32 %v241_v10, 0.0  ;;  %v256_v15 = vadd.f32 %v1171_v11, %v1662_v62  ;;  %v321_v58 = vadd.f32 %v1662_v62, %v320_v17  ;;  %v408_v7 = vmax.f32 %v326_v2, 0.0 }
  0xce   :  { %v250_v16 = vpop.f32.mrf.mxu0  ;;  %v1674_v20 = vpop.f32.mrf.mxu1 }
  0xcf   :  { %v251_v18 = vadd.f32 %v1662_v62, %v250_v16  ;;  %1246 = vmatprep.mubr.f32.mxu1 %v391_v13  ;;  %v394_v22 = vmax.f32 %v256_v15, 0.0  ;;  %v407_v63 = vmax.f32 %v321_v58, 0.0  ;;  %v336_v4 = vadd.f32 %v1674_v20, %v1662_v62 }
  0xd0   :  { %v1174_v19 = vpop.f32.mrf.mxu0  ;;  %1247 = vmatmul.mubr.f32.gmra.mxu1 %v392_v14  ;;  %v330_v25 = vpop.f32.mrf.mxu1 }
  0xd1   :  { %v393_v21 = vmax.f32 %v251_v18, 0.0  ;;  %v266_v23 = vadd.f32 %v1174_v19, %v1662_v62  ;;  %v331_v0 = vadd.f32 %v1662_v62, %v330_v25  ;;  %v410_v11 = vmax.f32 %v336_v4, 0.0 }
  0xd2   :  { %v260_v24 = vpop.f32.mrf.mxu0  ;;  %v1198_v32 = vpop.f32.mrf.mxu1 }
  0xd3   :  { %v261_v26 = vadd.f32 %v1662_v62, %v260_v24  ;;  %1249 = vmatprep.mubr.f32.mxu1 %v393_v21  ;;  %v396_v29 = vmax.f32 %v266_v23, 0.0  ;;  %v409_v5 = vmax.f32 %v331_v0, 0.0  ;;  %v346_v13 = vadd.f32 %v1198_v32, %v1662_v62  ;;  %v703_v32 = vld [vmem:[%s1796_s5 + $0x10] sm:$0xff] }
  0xd4   :  { %v1177_v27 = vpop.f32.mrf.mxu0  ;;  %1250 = vmatmul.mubr.f32.gmra.mxu1 %v394_v22  ;;  %v340_v39 = vpop.f32.mrf.mxu1  ;;  %1317 = vmatprep.subr.mxu0 %v703_v32 }
  0xd5   :  { %v395_v28 = vmax.f32 %v261_v26, 0.0  ;;  %v276_v30 = vadd.f32 %v1177_v27, %v1662_v62  ;;  %v341_v6 = vadd.f32 %v1662_v62, %v340_v39  ;;  %v412_v16 = vmax.f32 %v346_v13, 0.0  ;;  %1318 = vmatpush3.msra.mxu0 %v703_v32 }
  0xd6   :  { %v270_v31 = vpop.f32.mrf.mxu0  ;;  %v1201_v46 = vpop.f32.mrf.mxu1 }
  0xd7   :  { %v271_v33 = vadd.f32 %v1662_v62, %v270_v31  ;;  %1252 = vmatprep.mubr.f32.mxu1 %v395_v28  ;;  %v398_v36 = vmax.f32 %v276_v30, 0.0  ;;  %v411_v9 = vmax.f32 %v341_v6, 0.0  ;;  %v356_v17 = vadd.f32 %v1201_v46, %v1662_v62 }
  0xd8   :  { %v1180_v34 = vpop.f32.mrf.mxu0  ;;  %1253 = vmatmul.mubr.f32.gmra.mxu1 %v396_v29  ;;  %v350_v54 = vpop.f32.mrf.mxu1 }
  0xd9   :  { %v397_v35 = vmax.f32 %v271_v33, 0.0  ;;  %v286_v37 = vadd.f32 %v1180_v34, %v1662_v62  ;;  %v351_v10 = vadd.f32 %v1662_v62, %v350_v54  ;;  %v414_v21 = vmax.f32 %v356_v17, 0.0  ;;  %v702_v33 = vld [vmem:[%s1796_s5 + $0x8] sm:$0xff]  ;;  %v1717_v34 = vld [vmem:[%s1795_s4] ss:$0 sm:$0xff] }
  0xda   :  { %v280_v38 = vpop.f32.mrf.mxu0  ;;  %v1204_v61 = vpop.f32.mrf.mxu1  ;;  %1319 = vmatprep.subr.mxu0 %v702_v33 }
  0xdb   :  { %v281_v40 = vadd.f32 %v1662_v62, %v280_v38  ;;  %1255 = vmatprep.mubr.f32.mxu1 %v397_v35  ;;  %v400_v43 = vmax.f32 %v286_v37, 0.0  ;;  %v413_v14 = vmax.f32 %v351_v10, 0.0  ;;  %v366_v22 = vadd.f32 %v1204_v61, %v1662_v62  ;;  %1320 = vmatpush3.msra.mxu0 %v702_v33 }
  0xdc   :  { %v1183_v41 = vpop.f32.mrf.mxu0  ;;  %1256 = vmatmul.mubr.f32.gmra.mxu1 %v398_v36  ;;  %v360_v3 = vpop.f32.mrf.mxu1 }
  0xdd   :  { %v399_v42 = vmax.f32 %v281_v40, 0.0  ;;  %v296_v44 = vadd.f32 %v1183_v41, %v1662_v62  ;;  %v361_v15 = vadd.f32 %v1662_v62, %v360_v3  ;;  %v416_v26 = vmax.f32 %v366_v22, 0.0 }
  0xde   :  { %v290_v45 = vpop.f32.mrf.mxu0  ;;  %v1207_v8 = vpop.f32.mrf.mxu1 }
  0xdf   :  { %v291_v47 = vadd.f32 %v1662_v62, %v290_v45  ;;  %1258 = vmatprep.mubr.f32.mxu1 %v399_v42  ;;  %v402_v51 = vmax.f32 %v296_v44, 0.0  ;;  %v415_v19 = vmax.f32 %v361_v15, 0.0  ;;  %v376_v27 = vadd.f32 %v1207_v8, %v1662_v62 }
  0xe0   :  { %v1186_v48 = vpop.f32.mrf.mxu0  ;;  %1259 = vmatmul.mubr.f32.gmra.mxu1 %v400_v43  ;;  %v370_v12 = vpop.f32.mrf.mxu1 }
  0xe1   :  { %v401_v49 = vmax.f32 %v291_v47, 0.0  ;;  %v306_v52 = vadd.f32 %v1186_v48, %v1662_v62  ;;  %v371_v20 = vadd.f32 %v1662_v62, %v370_v12  ;;  %v418_v29 = vmax.f32 %v376_v27, 0.0 }
  0xe2   :  { %v300_v53 = vpop.f32.mrf.mxu0  ;;  %v1210_v18 = vpop.f32.mrf.mxu1 }
  0xe3   :  { %v301_v55 = vadd.f32 %v1662_v62, %v300_v53  ;;  %1261 = vmatprep.mubr.f32.mxu1 %v401_v49  ;;  %v404_v59 = vmax.f32 %v306_v52, 0.0  ;;  %v417_v24 = vmax.f32 %v371_v20, 0.0  ;;  %v386_v30 = vadd.f32 %v1210_v18, %v1662_v62 }
  0xe4   :  { %1262 = vmatmul.mubr.f32.gmra.mxu1 %v402_v51  ;;  %v380_v23 = vpop.f32.mrf.mxu1 }
  0xe5   :  { %v403_v56 = vmax.f32 %v301_v55, 0.0  ;;  %v381_v25 = vadd.f32 %v1662_v62, %v380_v23  ;;  %v420_v31 = vmax.f32 %v386_v30, 0.0  ;;  %v701_v62 = vld [vmem:[%s1796_s5] sm:$0xff] }
  0xe6   :  { %1321 = vmatprep.subr.mxu0 %v701_v62 }
  0xe7   :  { %1264 = vmatprep.mubr.f32.mxu1 %v403_v56  ;;  %v419_v28 = vmax.f32 %v381_v25, 0.0  ;;  %1322 = vmatpush3.msra.mxu0 %v701_v62 }
  0xe8   :  { %1265 = vmatmul.mubr.f32.gmra.mxu1 %v404_v59 }
  0xe9   :  { %1267 = vmatprep.mubr.f32.mxu1 %v405_v57 }
  0xec   :  { %1268 = vmatmul.mubr.f32.gmra.mxu1 %v406_v1 }
  0xed   :  { %1270 = vmatprep.mubr.f32.mxu1 %v407_v63 }
  0xf0   :  { %1271 = vmatmul.mubr.f32.gmra.mxu1 %v408_v7 }
  0xf1   :  { %1273 = vmatprep.mubr.f32.mxu1 %v409_v5 }
  0xf4   :  { %1274 = vmatmul.mubr.f32.gmra.mxu1 %v410_v11 }
  0xf5   :  { %1276 = vmatprep.mubr.f32.mxu1 %v411_v9 }
  0xf8   :  { %1277 = vmatmul.mubr.f32.gmra.mxu1 %v412_v16 }
  0xf9   :  { %1279 = vmatprep.mubr.f32.mxu1 %v413_v14 }
  0xfc   :  { %1280 = vmatmul.mubr.f32.gmra.mxu1 %v414_v21 }
  0xfd   :  { %1282 = vmatprep.mubr.f32.mxu1 %v415_v19 }
 0x100   :  { %1283 = vmatmul.mubr.f32.gmra.mxu1 %v416_v26 }
 0x101   :  { %1285 = vmatprep.mubr.f32.mxu1 %v417_v24 }
 0x104   :  { %1286 = vmatmul.mubr.f32.gmra.mxu1 %v418_v29 }
 0x105   :  { %1288 = vmatprep.mubr.f32.mxu1 %v419_v28 }
 0x108   :  { %1289 = vmatmul.mubr.f32.gmra.mxu1 %v420_v31 }
 0x18c   :  { %v1245_v35 = vpop.f32.mrf.mxu1 }
 0x18d   :  { %v516_v36 = vadd.f32 %v1245_v35, %v1717_v34 }
 0x18e   :  { %v510_v37 = vpop.f32.mrf.mxu1 }
 0x18f   :  { %v511_v38 = vadd.f32 %v1717_v34, %v510_v37  ;;  %v670_v41 = vmax.f32 %v516_v36, 0.0 }
 0x190   :  { %v1248_v39 = vpop.f32.mrf.mxu1 }
 0x191   :  { %v669_v40 = vmax.f32 %v511_v38, 0.0  ;;  %v526_v42 = vadd.f32 %v1248_v39, %v1717_v34 }
 0x192   :  { %v520_v43 = vpop.f32.mrf.mxu1 }
 0x193   :  { %v521_v44 = vadd.f32 %v1717_v34, %v520_v43  ;;  %1323 = vmatprep.mubr.f32.mxu0 %v669_v40  ;;  %v672_v47 = vmax.f32 %v526_v42, 0.0 }
 0x194   :  { %v1251_v45 = vpop.f32.mrf.mxu1  ;;  %1324 = vmatmul.mubr.f32.vlgmr.msra.gmra.mxu0 %v670_v41 }
 0x195   :  { %v671_v46 = vmax.f32 %v521_v44, 0.0  ;;  %v536_v48 = vadd.f32 %v1251_v45, %v1717_v34 }
 0x196   :  { %v530_v49 = vpop.f32.mrf.mxu1 }
 0x197   :  { %v531_v50 = vadd.f32 %v1717_v34, %v530_v49  ;;  %1326 = vmatprep.mubr.f32.mxu0 %v671_v46  ;;  %v674_v53 = vmax.f32 %v536_v48, 0.0 }
 0x198   :  { %v1254_v51 = vpop.f32.mrf.mxu1  ;;  %1327 = vmatmul.mubr.f32.gmra.mxu0 %v672_v47 }
 0x199   :  { %v673_v52 = vmax.f32 %v531_v50, 0.0  ;;  %v546_v54 = vadd.f32 %v1254_v51, %v1717_v34 }
 0x19a   :  { %v540_v55 = vpop.f32.mrf.mxu1 }
 0x19b   :  { %v541_v56 = vadd.f32 %v1717_v34, %v540_v55  ;;  %1329 = vmatprep.mubr.f32.mxu0 %v673_v52  ;;  %v676_v59 = vmax.f32 %v546_v54, 0.0 }
 0x19c   :  { %v1257_v57 = vpop.f32.mrf.mxu1  ;;  %1330 = vmatmul.mubr.f32.gmra.mxu0 %v674_v53 }
 0x19d   :  { %v675_v58 = vmax.f32 %v541_v56, 0.0  ;;  %v556_v60 = vadd.f32 %v1257_v57, %v1717_v34 }
 0x19e   :  { %v550_v61 = vpop.f32.mrf.mxu1 }
 0x19f   :  { %v551_v63 = vadd.f32 %v1717_v34, %v550_v61  ;;  %1332 = vmatprep.mubr.f32.mxu0 %v675_v58  ;;  %v678_v2 = vmax.f32 %v556_v60, 0.0 }
 0x1a0   :  { %v1260_v0 = vpop.f32.mrf.mxu1  ;;  %1333 = vmatmul.mubr.f32.gmra.mxu0 %v676_v59 }
 0x1a1   :  { %v677_v1 = vmax.f32 %v551_v63, 0.0  ;;  %v566_v3 = vadd.f32 %v1260_v0, %v1717_v34 }
 0x1a2   :  { %v560_v5 = vpop.f32.mrf.mxu1 }
 0x1a3   :  { %v561_v6 = vadd.f32 %v1717_v34, %v560_v5  ;;  %1335 = vmatprep.mubr.f32.mxu0 %v677_v1  ;;  %v680_v8 = vmax.f32 %v566_v3, 0.0 }
 0x1a4   :  { %v1263_v7 = vpop.f32.mrf.mxu1  ;;  %1336 = vmatmul.mubr.f32.gmra.mxu0 %v678_v2 }
 0x1a5   :  { %v679_v4 = vmax.f32 %v561_v6, 0.0  ;;  %v576_v9 = vadd.f32 %v1263_v7, %v1717_v34  ;;  %v1754_v6 = vld [vmem:[%s1797_s6] ss:$0 sm:$0xff]  ;;  %s1398_s6 = smov [#allocation2]  }
 0x1a6   :  { %v570_v10 = vpop.f32.mrf.mxu1  ;;  %s986_s9 = sshll.u32 %s1398_s6, 4  ;;  %s987_s9 = int_to_ptr.vmem [resolvable:$true] %s986_s9 }
 0x1a7   :  { %v571_v11 = vadd.f32 %v1717_v34, %v570_v10  ;;  %1338 = vmatprep.mubr.f32.mxu0 %v679_v4  ;;  %v682_v14 = vmax.f32 %v576_v9, 0.0  ;;  %s1376_s10 = scalar_lea.vmem %s987_s9, 4096  ;;  %p1381_p1 = scmp.lt.s32.totalorder %s987_s9, %s987_s9 }
 0x1a8   :  { %v1266_v13 = vpop.f32.mrf.mxu1  ;;  %1339 = vmatmul.mubr.f32.gmra.mxu0 %v680_v8  ;;  %p1377_p0 = scmp.ne.s32.totalorder %s987_s9, %s1376_s10  ;;  %p1382_p2 = scmp.lt.s32.totalorder %s1376_s10, %s1376_s10 }
 0x1a9   :  { %v681_v12 = vmax.f32 %v571_v11, 0.0  ;;  %v586_v15 = vadd.f32 %v1266_v13, %v1717_v34 }
 0x1aa   :  { %v580_v16 = vpop.f32.mrf.mxu1  ;;  %p1383_p3 = por %p1382_p2, %p1381_p1 }
 0x1ab   :  { %v581_v17 = vadd.f32 %v1717_v34, %v580_v16  ;;  %1341 = vmatprep.mubr.f32.mxu0 %v681_v12  ;;  %v684_v20 = vmax.f32 %v586_v15, 0.0 }
 0x1ac   :  { %v1269_v18 = vpop.f32.mrf.mxu1  ;;  %1342 = vmatmul.mubr.f32.gmra.mxu0 %v682_v14  ;;  %p1384_p4 = pnand %p1383_p3, %p1377_p0 }
 0x1ad   :  { %v683_v19 = vmax.f32 %v581_v17, 0.0  ;;  %v596_v21 = vadd.f32 %v1269_v18, %v1717_v34 }
 0x1ae   :  { %v590_v22 = vpop.f32.mrf.mxu1 }
 0x1af   :  { %v591_v23 = vadd.f32 %v1717_v34, %v590_v22  ;;  %1344 = vmatprep.mubr.f32.mxu0 %v683_v19  ;;  %v686_v26 = vmax.f32 %v596_v21, 0.0 }
 0x1b0   :  { %v1272_v24 = vpop.f32.mrf.mxu1  ;;  %1345 = vmatmul.mubr.f32.gmra.mxu0 %v684_v20 }
 0x1b1   :  { %v685_v25 = vmax.f32 %v591_v23, 0.0  ;;  %v606_v27 = vadd.f32 %v1272_v24, %v1717_v34 }
 0x1b2   :  { %v600_v28 = vpop.f32.mrf.mxu1 }
 0x1b3   :  { %v601_v29 = vadd.f32 %v1717_v34, %v600_v28  ;;  %1347 = vmatprep.mubr.f32.mxu0 %v685_v25  ;;  %v688_v32 = vmax.f32 %v606_v27, 0.0 }
 0x1b4   :  { %v1275_v30 = vpop.f32.mrf.mxu1  ;;  %1348 = vmatmul.mubr.f32.gmra.mxu0 %v686_v26 }
 0x1b5   :  { %v687_v31 = vmax.f32 %v601_v29, 0.0  ;;  %v616_v33 = vadd.f32 %v1275_v30, %v1717_v34 }
 0x1b6   :  { %v610_v62 = vpop.f32.mrf.mxu1 }
 0x1b7   :  { %v611_v35 = vadd.f32 %v1717_v34, %v610_v62  ;;  %1350 = vmatprep.mubr.f32.mxu0 %v687_v31  ;;  %v690_v38 = vmax.f32 %v616_v33, 0.0 }
 0x1b8   :  { %v1278_v36 = vpop.f32.mrf.mxu1  ;;  %1351 = vmatmul.mubr.f32.gmra.mxu0 %v688_v32 }
 0x1b9   :  { %v689_v37 = vmax.f32 %v611_v35, 0.0  ;;  %v626_v39 = vadd.f32 %v1278_v36, %v1717_v34 }
 0x1ba   :  { %v620_v40 = vpop.f32.mrf.mxu1 }
 0x1bb   :  { %v621_v41 = vadd.f32 %v1717_v34, %v620_v40  ;;  %1353 = vmatprep.mubr.f32.mxu0 %v689_v37  ;;  %v692_v44 = vmax.f32 %v626_v39, 0.0 }
 0x1bc   :  { %v1281_v42 = vpop.f32.mrf.mxu1  ;;  %1354 = vmatmul.mubr.f32.gmra.mxu0 %v690_v38 }
 0x1bd   :  { %v691_v43 = vmax.f32 %v621_v41, 0.0  ;;  %v636_v45 = vadd.f32 %v1281_v42, %v1717_v34 }
 0x1be   :  { %v630_v46 = vpop.f32.mrf.mxu1 }
 0x1bf   :  { %v631_v47 = vadd.f32 %v1717_v34, %v630_v46  ;;  %1356 = vmatprep.mubr.f32.mxu0 %v691_v43  ;;  %v694_v50 = vmax.f32 %v636_v45, 0.0 }
 0x1c0   :  { %v1284_v48 = vpop.f32.mrf.mxu1  ;;  %1357 = vmatmul.mubr.f32.gmra.mxu0 %v692_v44 }
 0x1c1   :  { %v693_v49 = vmax.f32 %v631_v47, 0.0  ;;  %v646_v51 = vadd.f32 %v1284_v48, %v1717_v34 }
 0x1c2   :  { %v640_v52 = vpop.f32.mrf.mxu1 }
 0x1c3   :  { %v641_v53 = vadd.f32 %v1717_v34, %v640_v52  ;;  %1359 = vmatprep.mubr.f32.mxu0 %v693_v49  ;;  %v696_v56 = vmax.f32 %v646_v51, 0.0 }
 0x1c4   :  { %v1287_v54 = vpop.f32.mrf.mxu1  ;;  %1360 = vmatmul.mubr.f32.gmra.mxu0 %v694_v50 }
 0x1c5   :  { %v695_v55 = vmax.f32 %v641_v53, 0.0  ;;  %v656_v57 = vadd.f32 %v1287_v54, %v1717_v34 }
 0x1c6   :  { %v650_v58 = vpop.f32.mrf.mxu1 }
 0x1c7   :  { %v651_v59 = vadd.f32 %v1717_v34, %v650_v58  ;;  %1362 = vmatprep.mubr.f32.mxu0 %v695_v55  ;;  %v698_v63 = vmax.f32 %v656_v57, 0.0 }
 0x1c8   :  { %v1290_v60 = vpop.f32.mrf.mxu1  ;;  %1363 = vmatmul.mubr.f32.gmra.mxu0 %v696_v56 }
 0x1c9   :  { %v697_v61 = vmax.f32 %v651_v59, 0.0  ;;  %v666_v0 = vadd.f32 %v1290_v60, %v1717_v34 }
 0x1ca   :  { %v660_v1 = vpop.f32.mrf.mxu1 }
 0x1cb   :  { %v661_v2 = vadd.f32 %v1717_v34, %v660_v1  ;;  %1365 = vmatprep.mubr.f32.mxu0 %v697_v61  ;;  %v700_v5 = vmax.f32 %v666_v0, 0.0 }
 0x1cc   :  { %1366 = vmatmul.mubr.f32.gmra.mxu0 %v698_v63 }
 0x1cd   :  { %v699_v3 = vmax.f32 %v661_v2, 0.0 }
 0x1cf   :  { %1368 = vmatprep.mubr.f32.mxu0 %v699_v3 }
 0x1d0   :  { %1369 = vmatmul.mubr.f32.gmra.mxu0 %v700_v5 }
 0x254   :  { %v1325_v7 = vpop.f32.mrf.mxu0 }
 0x255   :  { %v796_v4 = vadd.f32 %v1325_v7, %v1754_v6 }
 0x256   :  { %v790_v8 = vpop.f32.mrf.mxu0 }
 0x257   :  { %950 = vst [vmem:[#allocation2 + $0x8] sm:$0xff] %v796_v4  ;;  %v791_v9 = vadd.f32 %v1754_v6, %v790_v8 }
 0x258   :  { %v1328_v10 = vpop.f32.mrf.mxu0 }
 0x259   :  { %949 = vst [vmem:[#allocation2] sm:$0xff] %v791_v9  ;;  %v806_v34 = vadd.f32 %v1328_v10, %v1754_v6 }
 0x25a   :  { %v800_v11 = vpop.f32.mrf.mxu0 }
 0x25b   :  { %952 = vst [vmem:[#allocation2 + $0x18] sm:$0xff] %v806_v34  ;;  %v801_v13 = vadd.f32 %v1754_v6, %v800_v11 }
 0x25c   :  { %v1331_v12 = vpop.f32.mrf.mxu0 }
 0x25d   :  { %951 = vst [vmem:[#allocation2 + $0x10] sm:$0xff] %v801_v13  ;;  %v816_v14 = vadd.f32 %v1331_v12, %v1754_v6 }
 0x25e   :  { %v810_v15 = vpop.f32.mrf.mxu0 }
 0x25f   :  { %954 = vst [vmem:[#allocation2 + $0x28] sm:$0xff] %v816_v14  ;;  %v811_v16 = vadd.f32 %v1754_v6, %v810_v15 }
 0x260   :  { %v1334_v17 = vpop.f32.mrf.mxu0 }
 0x261   :  { %953 = vst [vmem:[#allocation2 + $0x20] sm:$0xff] %v811_v16  ;;  %v826_v18 = vadd.f32 %v1334_v17, %v1754_v6 }
 0x262   :  { %v820_v19 = vpop.f32.mrf.mxu0 }
 0x263   :  { %956 = vst [vmem:[#allocation2 + $0x38] sm:$0xff] %v826_v18  ;;  %v821_v20 = vadd.f32 %v1754_v6, %v820_v19 }
 0x264   :  { %v1337_v21 = vpop.f32.mrf.mxu0 }
 0x265   :  { %955 = vst [vmem:[#allocation2 + $0x30] sm:$0xff] %v821_v20  ;;  %v836_v22 = vadd.f32 %v1337_v21, %v1754_v6 }
 0x266   :  { %v830_v23 = vpop.f32.mrf.mxu0 }
 0x267   :  { %958 = vst [vmem:[#allocation2 + $0x48] sm:$0xff] %v836_v22  ;;  %v831_v24 = vadd.f32 %v1754_v6, %v830_v23 }
 0x268   :  { %v1340_v25 = vpop.f32.mrf.mxu0 }
 0x269   :  { %957 = vst [vmem:[#allocation2 + $0x40] sm:$0xff] %v831_v24  ;;  %v846_v26 = vadd.f32 %v1340_v25, %v1754_v6 }
 0x26a   :  { %v840_v27 = vpop.f32.mrf.mxu0 }
 0x26b   :  { %960 = vst [vmem:[#allocation2 + $0x58] sm:$0xff] %v846_v26  ;;  %v841_v28 = vadd.f32 %v1754_v6, %v840_v27 }
 0x26c   :  { %v1343_v29 = vpop.f32.mrf.mxu0 }
 0x26d   :  { %959 = vst [vmem:[#allocation2 + $0x50] sm:$0xff] %v841_v28  ;;  %v856_v30 = vadd.f32 %v1343_v29, %v1754_v6 }
 0x26e   :  { %v850_v31 = vpop.f32.mrf.mxu0 }
 0x26f   :  { %962 = vst [vmem:[#allocation2 + $0x68] sm:$0xff] %v856_v30  ;;  %v851_v32 = vadd.f32 %v1754_v6, %v850_v31 }
 0x270   :  { %v1346_v33 = vpop.f32.mrf.mxu0 }
 0x271   :  { %961 = vst [vmem:[#allocation2 + $0x60] sm:$0xff] %v851_v32  ;;  %v866_v62 = vadd.f32 %v1346_v33, %v1754_v6 }
 0x272   :  { %v860_v35 = vpop.f32.mrf.mxu0 }
 0x273   :  { %964 = vst [vmem:[#allocation2 + $0x78] sm:$0xff] %v866_v62  ;;  %v861_v36 = vadd.f32 %v1754_v6, %v860_v35 }
 0x274   :  { %v1349_v37 = vpop.f32.mrf.mxu0 }
 0x275   :  { %963 = vst [vmem:[#allocation2 + $0x70] sm:$0xff] %v861_v36  ;;  %v876_v38 = vadd.f32 %v1349_v37, %v1754_v6 }
 0x276   :  { %v870_v39 = vpop.f32.mrf.mxu0 }
 0x277   :  { %966 = vst [vmem:[#allocation2 + $0x88] sm:$0xff] %v876_v38  ;;  %v871_v40 = vadd.f32 %v1754_v6, %v870_v39 }
 0x278   :  { %v1352_v41 = vpop.f32.mrf.mxu0 }
 0x279   :  { %965 = vst [vmem:[#allocation2 + $0x80] sm:$0xff] %v871_v40  ;;  %v886_v42 = vadd.f32 %v1352_v41, %v1754_v6 }
 0x27a   :  { %v880_v43 = vpop.f32.mrf.mxu0 }
 0x27b   :  { %968 = vst [vmem:[#allocation2 + $0x98] sm:$0xff] %v886_v42  ;;  %v881_v44 = vadd.f32 %v1754_v6, %v880_v43 }
 0x27c   :  { %v1355_v45 = vpop.f32.mrf.mxu0 }
 0x27d   :  { %967 = vst [vmem:[#allocation2 + $0x90] sm:$0xff] %v881_v44  ;;  %v896_v46 = vadd.f32 %v1355_v45, %v1754_v6 }
 0x27e   :  { %v890_v47 = vpop.f32.mrf.mxu0 }
 0x27f   :  { %970 = vst [vmem:[#allocation2 + $0xa8] sm:$0xff] %v896_v46  ;;  %v891_v48 = vadd.f32 %v1754_v6, %v890_v47 }
 0x280   :  { %v1358_v49 = vpop.f32.mrf.mxu0 }
 0x281   :  { %969 = vst [vmem:[#allocation2 + $0xa0] sm:$0xff] %v891_v48  ;;  %v906_v50 = vadd.f32 %v1358_v49, %v1754_v6 }
 0x282   :  { %v900_v51 = vpop.f32.mrf.mxu0 }
 0x283   :  { %972 = vst [vmem:[#allocation2 + $0xb8] sm:$0xff] %v906_v50  ;;  %v901_v52 = vadd.f32 %v1754_v6, %v900_v51 }
 0x284   :  { %v1361_v53 = vpop.f32.mrf.mxu0 }
 0x285   :  { %971 = vst [vmem:[#allocation2 + $0xb0] sm:$0xff] %v901_v52  ;;  %v916_v54 = vadd.f32 %v1361_v53, %v1754_v6 }
 0x286   :  { %v910_v55 = vpop.f32.mrf.mxu0 }
 0x287   :  { %974 = vst [vmem:[#allocation2 + $0xc8] sm:$0xff] %v916_v54  ;;  %v911_v56 = vadd.f32 %v1754_v6, %v910_v55 }
 0x288   :  { %v1364_v57 = vpop.f32.mrf.mxu0 }
 0x289   :  { %973 = vst [vmem:[#allocation2 + $0xc0] sm:$0xff] %v911_v56  ;;  %v926_v58 = vadd.f32 %v1364_v57, %v1754_v6 }
 0x28a   :  { %v920_v59 = vpop.f32.mrf.mxu0 }
 0x28b   :  { %976 = vst [vmem:[#allocation2 + $0xd8] sm:$0xff] %v926_v58  ;;  %v921_v60 = vadd.f32 %v1754_v6, %v920_v59 }
 0x28c   :  { %v1367_v61 = vpop.f32.mrf.mxu0 }
 0x28d   :  { %975 = vst [vmem:[#allocation2 + $0xd0] sm:$0xff] %v921_v60  ;;  %v936_v63 = vadd.f32 %v1367_v61, %v1754_v6 }
 0x28e   :  { %v930_v0 = vpop.f32.mrf.mxu0 }
 0x28f   :  { %978 = vst [vmem:[#allocation2 + $0xe8] sm:$0xff] %v936_v63  ;;  %v931_v1 = vadd.f32 %v1754_v6, %v930_v0 }
 0x290   :  { %v1370_v2 = vpop.f32.mrf.mxu0 }
 0x291   :  { %977 = vst [vmem:[#allocation2 + $0xe0] sm:$0xff] %v931_v1  ;;  %v946_v3 = vadd.f32 %v1370_v2, %v1754_v6 }
 0x292   :  { %v940_v5 = vpop.f32.mrf.mxu0 }
 0x293   :  { %980 = vst [vmem:[#allocation2 + $0xf8] sm:$0xff] %v946_v3  ;;  %v941_v7 = vadd.f32 %v1754_v6, %v940_v5 }
 0x295   :  { %979 = vst [vmem:[#allocation2 + $0xf0] sm:$0xff] %v941_v7 }
 0x296   :  { %1387 = shalt.err (!%p1384_p4)
}
 0x297   :  { %s1399_s11 = smov 128   ;;  %s1400_s12 = smov 8  }
 0x298   :  { %992 = dma.vmem_to_hbm [thread:$0]  %s987_s9, 4096, %s1798_s7, [#allocation3], %s1399_s11, %s1399_s11, %s1400_s12  }
 0x299   :  { %1396 = dma.done.wait [#allocation3], 4096  }
 0x29a   :  { %1397 = vsyncadd [#allocation3], 4294963200 }
 0x29b   :  { %996 = vsyncpa [#allocation3], 1 }

</bundles_post_ra>
